<compile_context>
chip_gen: v6e
topology: v6e:2x2x1
jax: 0.10.0
libtpu: 0.0.40
codegen_flags: <defaults>
</compile_context>

<pallas_src>
import jax
import jax.numpy as jnp
from jax.experimental import pallas as pl
from jax.experimental.pallas import tpu as pltpu


def attention_kernel(x_ref, wv_ref, bv_ref, wof_ref, bof_ref, o_ref):
    # v-projection on the MXU (K = input_dim, N = d_model), f32 accumulation.
    v = jnp.dot(x_ref[...], wv_ref[...],
                preferred_element_type=jnp.float32) + bv_ref[...]          # (TB, d_model)

    # softmax over a size-1 axis is exactly 1 -> attn_output == v.
    # fc_o and fc (eval-mode dropout = identity) are folded into one mat-vec,
    # realized as an elementwise multiply + lane reduce (MXU N=1 would waste it).
    out = jnp.sum(v * wof_ref[...], axis=-1, keepdims=True) + bof_ref[...]  # (TB, 1)

    # Output stays (TB, 1): last dim equals the full array dim, so the
    # BlockSpec constraint is satisfied; the 4 KiB/tile store is negligible
    # next to the streamed x tile.
    o_ref[...] = out.astype(o_ref.dtype)


def _pick_batch_tile(B, input_dim, block_b):
    """Largest batch tile (multiple of 8) whose double-buffered x fits a VMEM budget."""
    if B <= block_b:
        return B
    per_buffer_budget = 8 * 1024 * 1024            # bytes, per pipeline buffer
    rows_by_budget = max(8, per_buffer_budget // max(1, 4 * input_dim))
    tb = min(block_b, rows_by_budget)
    tb = max(8, (tb // 8) * 8)
    return min(tb, B)


def attention_mechanism(x, params, *, block_b=1024):
    """Fused eval-mode forward of AttentionMechanism."""
    B, input_dim = x.shape
    d_model = params["wv"].shape[1]

    # Eval-mode fold of fc ∘ dropout ∘ fc_o:  z @ (Wo @ Wf) + (bo @ Wf + bf).
    # TODO(synk): training-mode nn.Dropout(0.2) (RNG mask between fc_o and fc)
    # is not implemented; this folding is only valid in eval mode.
    w_of = (params["wo"] @ params["wf"]).reshape(1, d_model)    # (1, d_model)
    b_of = params["bo"] @ params["wf"] + params["bf"]           # (1, 1)

    tb = _pick_batch_tile(B, input_dim, block_b)
    grid = (pl.cdiv(B, tb),)

    # Advisory cost hint for the XLA scheduler around the custom call.
    cost = pl.CostEstimate(
        flops=2 * B * input_dim * d_model + 2 * B * d_model,
        transcendentals=0,
        bytes_accessed=4 * (B * input_dim + input_dim * d_model + 2 * d_model + B + 1),
    )

    return pl.pallas_call(
        attention_kernel,
        out_shape=jax.ShapeDtypeStruct((B, 1), jnp.float32),
        grid=grid,
        in_specs=[
            pl.BlockSpec((tb, input_dim), lambda i: (i, 0)),        # x: streamed tile
            pl.BlockSpec((input_dim, d_model), lambda i: (0, 0)),   # Wv: resident
            pl.BlockSpec((1, d_model), lambda i: (0, 0)),           # bv: resident
            pl.BlockSpec((1, d_model), lambda i: (0, 0)),           # w_of: resident
            pl.BlockSpec((1, 1), lambda i: (0, 0)),                 # b_of: resident
        ],
        out_specs=pl.BlockSpec((tb, 1), lambda i: (i, 0)),
        compiler_params=pltpu.CompilerParams(
            dimension_semantics=("parallel",),   # megacore sharding where available
        ),
        cost_estimate=cost,
    )(x, params["wv"], params["bv"], w_of, b_of)


def init_params(key, input_dim, d_model):
    ks = jax.random.split(key, 10)

    def linear(kw, kb, fan_in, fan_out):
        bound = 1.0 / jnp.sqrt(jnp.float32(fan_in))
        w = jax.random.uniform(kw, (fan_in, fan_out), jnp.float32, -bound, bound)
        b = jax.random.uniform(kb, (1, fan_out), jnp.float32, -bound, bound)
        return w, b

    wq, bq = linear(ks[0], ks[1], input_dim, d_model)
    wk, bk = linear(ks[2], ks[3], input_dim, d_model)
    wv, bv = linear(ks[4], ks[5], input_dim, d_model)
    wo, bo = linear(ks[6], ks[7], d_model, input_dim)
    wf, bf = linear(ks[8], ks[9], input_dim, 1)
    return dict(wq=wq, bq=bq, wk=wk, bk=bk, wv=wv, bv=bv,
                wo=wo, bo=bo, wf=wf, bf=bf)


def reference(x, p):
    # Unfused eval-mode forward matching the PyTorch module op-for-op.
    q = x @ p["wq"] + p["bq"]
    k = x @ p["wk"] + p["bk"]
    v = x @ p["wv"] + p["bv"]
    s = jnp.sum(q * k, axis=-1, keepdims=True) / jnp.sqrt(jnp.float32(q.shape[-1]))
    attn = jax.nn.softmax(s[:, None, :], axis=-1)[:, 0, :]   # size-1 softmax -> ones
    h = (attn * v) @ p["wo"] + p["bo"]                       # dropout: identity (eval)
    return h @ p["wf"] + p["bf"]


if __name__ == "__main__":
    B, input_dim, d_model = 16, 32, 64
    key = jax.random.PRNGKey(0)
    kx, kp = jax.random.split(key)
    x = jax.random.normal(kx, (B, input_dim), jnp.float32)
    params = init_params(kp, input_dim, d_model)

    # block_b=8 -> grid of 2 batch tiles: exercises the pipelined grid with
    # resident weights while staying at small shapes.
    out = attention_mechanism(x, params, block_b=8)
    out = jax.block_until_ready(out)

    ref = reference(x, params)
    assert out.shape == (B, 1)
    assert jnp.allclose(out, ref, atol=1e-4, rtol=1e-4), \
        f"max abs err {jnp.max(jnp.abs(out - ref))}"
    print("KERNEL_OK")
</pallas_src>

<mosaic_0001>
module attributes {stable_mosaic.version = 11 : i64} {
  func.func @attention_kernel(%arg0: i32, %arg1: memref<8x32xf32, #tpu.memory_space<vmem>>, %arg2: memref<32x64xf32, #tpu.memory_space<vmem>>, %arg3: memref<1x64xf32, #tpu.memory_space<vmem>>, %arg4: memref<1x64xf32, #tpu.memory_space<vmem>>, %arg5: memref<1x1xf32, #tpu.memory_space<vmem>>, %arg6: memref<8x1xf32, #tpu.memory_space<vmem>>) attributes {dimension_semantics = [#tpu.dimension_semantics<parallel>], iteration_bounds = array<i64: 2>, scalar_prefetch = 0 : i64, scratch_operands = 0 : i64, tpu.core_type = #tpu.core_type<tc>, window_params = [{transform_indices = @transform_0, window_bounds = array<i64: 8, 32>}, {pipeline_mode = #tpu.pipeline_mode<synchronous>, transform_indices = @transform_1, window_bounds = array<i64: 32, 64>}, {pipeline_mode = #tpu.pipeline_mode<synchronous>, transform_indices = @transform_2, window_bounds = array<i64: 1, 64>}, {pipeline_mode = #tpu.pipeline_mode<synchronous>, transform_indices = @transform_3, window_bounds = array<i64: 1, 64>}, {pipeline_mode = #tpu.pipeline_mode<synchronous>, transform_indices = @transform_4, window_bounds = array<i64: 1, 1>}, {transform_indices = @transform_5, window_bounds = array<i64: 8, 1>}]} {
    %c0 = arith.constant 0 : index
    %c0_0 = arith.constant 0 : index
    %0 = vector.load %arg1[%c0, %c0_0] : memref<8x32xf32, #tpu.memory_space<vmem>>, vector<8x32xf32>
    %c0_1 = arith.constant 0 : index
    %c0_2 = arith.constant 0 : index
    %1 = vector.load %arg2[%c0_1, %c0_2] : memref<32x64xf32, #tpu.memory_space<vmem>>, vector<32x64xf32>
    %cst = arith.constant dense<0.000000e+00> : vector<8x64xf32>
    %2 = tpu.matmul %0, %1, %cst {dimension_numbers = #tpu.dot_dimension_numbers<[1], [0], [0], [1], [0, 0, 1, 1], [], []>} : vector<8x32xf32>, vector<32x64xf32>, vector<8x64xf32> -> vector<8x64xf32>
    %c0_3 = arith.constant 0 : index
    %c0_4 = arith.constant 0 : index
    %3 = vector.load %arg3[%c0_3, %c0_4] : memref<1x64xf32, #tpu.memory_space<vmem>>, vector<1x64xf32>
    %4 = vector.broadcast %3 : vector<1x64xf32> to vector<8x64xf32>
    %5 = arith.addf %2, %4 : vector<8x64xf32>
    %c0_5 = arith.constant 0 : index
    %c0_6 = arith.constant 0 : index
    %6 = vector.load %arg4[%c0_5, %c0_6] : memref<1x64xf32, #tpu.memory_space<vmem>>, vector<1x64xf32>
    %7 = vector.broadcast %6 : vector<1x64xf32> to vector<8x64xf32>
    %8 = arith.mulf %5, %7 : vector<8x64xf32>
    %cst_7 = arith.constant dense<0.000000e+00> : vector<8xf32>
    %9 = vector.multi_reduction <add>, %8, %cst_7 [1] : vector<8x64xf32> to vector<8xf32>
    %10 = vector.shape_cast %9 : vector<8xf32> to vector<8x1xf32>
    %c0_8 = arith.constant 0 : index
    %c0_9 = arith.constant 0 : index
    %11 = vector.load %arg5[%c0_8, %c0_9] : memref<1x1xf32, #tpu.memory_space<vmem>>, vector<1x1xf32>
    %12 = vector.broadcast %11 : vector<1x1xf32> to vector<8x1xf32>
    %13 = arith.addf %10, %12 : vector<8x1xf32>
    %c0_10 = arith.constant 0 : index
    %c0_11 = arith.constant 0 : index
    %14 = vector.load %arg6[%c0_10, %c0_11] : memref<8x1xf32, #tpu.memory_space<vmem>>, vector<8x1xf32>
    tpu.vector_store %arg6[%c0_10, %c0_11], %13 {strides = array<i32>} : memref<8x1xf32, #tpu.memory_space<vmem>>, vector<8x1xf32>,
    return
  }
  func.func @transform_0(%arg0: i32) -> (i32, i32) {
    %c0_i32 = arith.constant 0 : i32
    %c0_i32_0 = arith.constant 0 : i32
    return %arg0, %c0_i32 : i32, i32
  }
  func.func @transform_1(%arg0: i32) -> (i32, i32) {
    %c0_i32 = arith.constant 0 : i32
    %c0_i32_0 = arith.constant 0 : i32
    %c0_i32_1 = arith.constant 0 : i32
    return %c0_i32, %c0_i32_0 : i32, i32
  }
  func.func @transform_2(%arg0: i32) -> (i32, i32) {
    %c0_i32 = arith.constant 0 : i32
    %c0_i32_0 = arith.constant 0 : i32
    %c0_i32_1 = arith.constant 0 : i32
    return %c0_i32, %c0_i32_0 : i32, i32
  }
  func.func @transform_3(%arg0: i32) -> (i32, i32) {
    %c0_i32 = arith.constant 0 : i32
    %c0_i32_0 = arith.constant 0 : i32
    %c0_i32_1 = arith.constant 0 : i32
    return %c0_i32, %c0_i32_0 : i32, i32
  }
  func.func @transform_4(%arg0: i32) -> (i32, i32) {
    %c0_i32 = arith.constant 0 : i32
    %c0_i32_0 = arith.constant 0 : i32
    %c0_i32_1 = arith.constant 0 : i32
    return %c0_i32, %c0_i32_0 : i32, i32
  }
  func.func @transform_5(%arg0: i32) -> (i32, i32) {
    %c0_i32 = arith.constant 0 : i32
    %c0_i32_0 = arith.constant 0 : i32
    return %arg0, %c0_i32 : i32, i32
  }
}

</mosaic_0001>

<bundles_post_ra>
// kernel: tpu_custom_call.1
= control target key start
LH: loop header
LB: loop body
LE: loop exit
PB: predicated region body
PF: predicated region fallthrough
CT: control target
= control target key end

     0   :  { %s782_s0 = inlined_call_operand.hbm [shape: f32[16,32], index: 0, kind: input, shape index: {}]   ;;  %s783_s1 = inlined_call_operand.hbm [shape: f32[32,64], index: 1, kind: input, shape index: {}]   ;;  %s784_s2 = inlined_call_operand.vmem [shape: f32[1,64], index: 2, kind: input, shape index: {}]   ;;  %s785_s3 = inlined_call_operand.vmem [shape: f32[1,64], index: 3, kind: input, shape index: {}]   ;;  %s786_s4 = inlined_call_operand.<no memory space> [shape: f32[1,1], index: 4, kind: input, shape index: {}]   ;;  %s787_s5 = inlined_call_operand.vmem [shape: f32[16,1], index: 5, kind: output, shape index: {}]  }
   0x1   :  { %v10_v0 = vstv %s786_s4 }
   0x2   :  { %11 = vst [vmem:[#allocation2] sm:$0x1] %v10_v0 }
   0x3   :  { %12 = vsyncpa [#allocation4], 0 }
   0x4   :  { %14 = vsyncpa [#allocation4 + $0x1], 0 }
   0x5   :  { %15 = vsyncpa [#allocation6], 0  ;;  %s659_s20 = smov 0   ;;  %s661_s21 = smov 0  }
   0x6   :  { %s663_s22 = smov 0   ;;  %s665_s23 = smov 0  }
   0x7 LB: > { %s678_s4 = sadd.s32 4294967295, %s618_s23   ;;  %p41_p0 = scmp.ne.s32.totalorder %s610_s21, %s606_s20  ;;  %s618_s23 = sphi %s665_s23, %s802_s23   ;;  %s614_s22 = sphi %s663_s22, %s801_s22   ;;  %s610_s21 = sphi %s661_s21, %s800_s21   ;;  %s606_s20 = sphi %s659_s20, %s799_s20  }
   0x8   : > { %p788_p1 = scmp.eq.s32.totalorder %s678_s4, 0  ;;  %p441_p2 = scmp.ge.s32.totalorder %s618_s23, 1 }
   0x9   : > { %p162_p3 = scmp.lt.s32.totalorder %s618_s23, 3  ;;  %s620_s26 = smov [#allocation5]  }
   0xa   : > { %p686_p4 = por %p788_p1, %p41_p0  ;;  %s174_s27 = sshll.u32 %s620_s26, 4  ;;  %s175_s27 = int_to_ptr.vmem [resolvable:$true] %s174_s27 }
   0xb   : > { %p690_p5 = pnand %p441_p2, %p162_p3  ;;  %s703_s29 = sadd.s32 1, %s618_s23  }
   0xc   : > { %s791_s24 = scalar_select %p686_p4, 1, 0 }
   0xd   : > { %s792_s25 = scalar_select %p690_p5, 1, 0 }
   0xe   : > { %p478_p6 = pneg %p690_p5  ;;  %s28_s30 = sadd.s32 1, %s614_s22 }
   0xf   : > { %s25_s6 = ssub.s32 %s618_s23, %s703_s29  ;;  %s537_s7 = scalar_lea.vmem %s175_s27, 512 }
  0x10   : > { %p698_p7 = pnand %p478_p6, %p788_p1  ;;  %p538_p9 = scmp.ne.s32.totalorder %s175_s27, %s537_s7 }
  0x11   : > { %p545_p12 = scmp.lt.s32.totalorder %s175_s27, %s175_s27  ;;  %p546_p13 = scmp.lt.s32.totalorder %s537_s7, %s537_s7 }
  0x12   : > { %p528_p8 = pneg %p698_p7 }
  0x13   : > { %p547_p0 = por %p546_p13, %p545_p12 }
  0x14   : > { %p540_p10 = pnand %p538_p9, %p528_p8 }
  0x16   : > { %p541_p11 = pneg %p540_p10 }
  0x18   : > { %p548_p2 = pnand %p547_p0, %p541_p11 }
  0x1a   : > { %551 = shalt.err (!%p548_p2)
}
  0x1b   : > { %s621_s8 = smov 128   ;;  %s622_s9 = smov 8  }
  0x1c   : > { %481 = dma.hbm_to_vmem [thread:$0]  (!%p698_p7), %s783_s1, 512, %s175_s27, [#allocation6], %s621_s8, %s621_s8, %s622_s9  }
  0x1d   : > { %p26_p3 = scmp.eq.s32.totalorder %s25_s6, 0  ;;  %p35_p6 = scmp.ne.s32.totalorder %s614_s22, %s610_s21 }
  0x1e   : > { %p36_p8 = scmp.eq.s32.totalorder %s618_s23, 0  ;;  %p487_p9 = scmp.lt.s32.totalorder %s618_s23, 2 }
  0x1f   : > { %s720_s12 = scalar_select %p26_p3, %s614_s22, %s28_s30  }
  0x20   : > { %p37_p10 = por %p36_p8, %p35_p6  ;;  %s197_s13 = sand.u32 1, %s614_s22  }
  0x21   : > { %s444_s14 = sshll.u32 %s197_s13, 3  ;;  %s445_s15 = sshll.u32 %s618_s23, 7 }
  0x22   : > { %s727_s18 = scalar_lea.hbm %s782_s0, %s445_s15  ;;  %s201_s19 = scalar_lea.vmem [#allocation3], %s444_s14 }
  0x23   : > { %s208_s20 = sshll.u32 %s201_s19, 4  ;;  %p729_p7 = pnand %p487_p9, %p37_p10  ;;  %s209_s20 = int_to_ptr.vmem [resolvable:$true] %s208_s20 }
  0x24   : > { %s198_s27 = scalar_lea.sflag [#allocation4], %s197_s13  ;;  %s552_s28 = scalar_lea.hbm %s727_s18, 128 }
  0x25   : > { %p553_p11 = scmp.ne.s32.totalorder %s727_s18, %s552_s28  ;;  %p554_p12 = pneg %p729_p7 }
  0x26   : > { %s557_s6 = scalar_lea.hbm %s782_s0, 256  ;;  %p558_p2 = scmp.lt.s32.totalorder %s727_s18, %s782_s0 }
  0x27   : > { %p555_p13 = pnand %p554_p12, %p553_p11  ;;  %p559_p3 = scmp.lt.s32.totalorder %s557_s6, %s552_s28 }
  0x29   : > { %p556_p0 = pneg %p555_p13  ;;  %p560_p6 = por %p559_p3, %p558_p2 }
  0x2b   : > { %p561_p8 = pnand %p560_p6, %p556_p0 }
  0x2d   : > { %564 = shalt.err (!%p561_p8)
}
  0x2e   : > { %s565_s9 = scalar_lea.vmem %s209_s20, 128  ;;  %s623_s10 = smov [#allocation3]  }
  0x2f   : > { %p566_p9 = scmp.ne.s32.totalorder %s209_s20, %s565_s9  ;;  %s570_s11 = sshll.u32 %s623_s10, 4  ;;  %s571_s11 = int_to_ptr.vmem [resolvable:$false] %s570_s11 }
  0x30   : > { %s572_s13 = scalar_lea.vmem %s571_s11, 256  ;;  %p573_p11 = scmp.lt.s32.totalorder %s209_s20, %s571_s11 }
  0x31   : > { %p568_p10 = pnand %p566_p9, %p554_p12  ;;  %p574_p13 = scmp.lt.s32.totalorder %s572_s13, %s565_s9 }
  0x33   : > { %p569_p1 = pneg %p568_p10  ;;  %p575_p4 = por %p574_p13, %p573_p11 }
  0x35   : > { %p576_p5 = pnand %p575_p4, %p569_p1 }
  0x37   : > { %579 = shalt.err (!%p576_p5)
}
  0x38   : > { %485 = dma.hbm_to_vmem [thread:$0]  (!%p729_p7), %s727_s18, 128, %s209_s20, %s198_s27  }
  0x39   : > { %p795_p0 = scmp.ne.s32.totalorder %s792_s25, 0 }
  0x3a   : > { %s219_s14 = sand.u32 (!%p795_p0), 1, %s610_s21   ;;  %p796_p12 = scmp.ne.s32.totalorder (!%p795_p0), %s791_s24, 0 }
  0x3b   : > { %217 = sbr.rel (%p795_p0) target bundleno = 416 (0x1a0), region = 40  ;;  %s447_s15 = sshll.u32 (!%p795_p0), %s219_s14, 3 }
  0x3c   : > { %s220_s16 = scalar_lea.sflag (!%p795_p0), [#allocation4], %s219_s14  ;;  %s223_s17 = scalar_lea.vmem (!%p795_p0), [#allocation3], %s447_s15 }
  0x40   : > { %597 = dma.done.wait (%p796_p12), %s220_s16, 128  }
  0x41   : > { %599 = vsyncadd (%p796_p12), %s220_s16, 4294967168  ;;  %p797_p1 = scmp.eq.s32.totalorder %s678_s4, 0 }
  0x43   : > { %601 = dma.done.wait (%p797_p1), [#allocation6], 512   ;;  %p798_p4 = pmov %p797_p1 }
  0x44   : > { %v624_v1 = vmov 0.0   ;;  %vm625_vm0 = vmmov 0   ;;  %v261_v2 = vld [vmem:[#allocation5 + $0x18] sm:$0xff]  ;;  %v260_v3 = vld [vmem:[#allocation5 + $0x10] sm:$0xff]  ;;  %v259_v4 = vld [vmem:[#allocation5 + $0x8] sm:$0xff]  ;;  %vm269_vm1 = vcmask 261120  }
  0x45   : > { %603 = vsyncadd (%p798_p4), [#allocation6], 4294966784  ;;  %461 = vmatprep.subr.mxu0 %v624_v1  ;;  %469 = vmatprep.mubr.msk.f32.mxu0 %vm625_vm0, %v624_v1  ;;  %v258_v5 = vld [vmem:[#allocation5] sm:$0xff]  ;;  %v257_v6 = vld [vmem:[%s223_s17] sm:$0xff]  ;;  %vm351_vm2 = vcmask 523264   ;;  %p253_p5 = scmp.lt.s32.totalorder %s678_s4, 1 }
  0x46   : > { %462 = vmatpush3.msra.mxu0 %v261_v2  ;;  %v450_v7 = vld [vmem:[%s784_s2] ss:$0 sm:$0xff]  ;;  %vm363_vm3 = vcmask 7168  }
  0x47   : > { %463 = vmatprep.subr.mxu0 %v624_v1  ;;  %v452_v9 = vld [vmem:[%s785_s3] ss:$0 sm:$0xff]  ;;  %s804_s4 = smov (!%p253_p5, %s678_s4), 1 }
  0x48   : > { %464 = vmatpush3.msra.mxu0 %v260_v3  ;;  %s449_s20 = sshll.u32 %s804_s4, 3  ;;  %v453_v14 = vld [vmem:[#allocation2] ss:$0 sm:$0xff] }
  0x49   : > { %465 = vmatprep.subr.mxu0 %v624_v1  ;;  %s256_s28 = scalar_lea.vmem %s787_s5, %s449_s20 }
  0x4a   : > { %466 = vmatpush3.msra.mxu0 %v259_v4 }
  0x4b   : > { %467 = vmatprep.subr.mxu0 %v624_v1 }
  0x4c   : > { %468 = vmatpush3.msra.mxu0 %v258_v5 }
  0x4d   : > { %470 = vmatmul.mubr.msk.f32.vlgmr.msra.gmra.mxu0 %vm269_vm1, %v257_v6 }
 0x10d   : > { %v339_v8 = vpop.f32.mrf.mxu0 }
 0x10e   : > { %v340_v10 = vadd.f32 %v450_v7, %v339_v8 }
 0x10f   : > { %v471_v11 = vpop.f32.mrf.mxu0 }
 0x110   : > { %v350_v12 = vmul.f32 %v452_v9, %v340_v10 }
 0x112   : > { %v352_v13 = vsel %vm351_vm2, %v350_v12, 0.0 }
 0x113   : > { %353 = vadd.xlane.f32.xlu0 %v352_v13 }
 0x19c   : > { %v354_v15 = vpop.xlane.xlu0 %353 }
 0x19d   : > { %v362_v16 = vadd.f32 %v453_v14, %v354_v15 }
 0x19f   : > { %364 = vst.msk [vmem:[%s256_s28] sm:$0xff] %vm363_vm3, %v362_v16 }
 0x1a0 PF: > { %p18_p7 = scmp.ge.s32.totalorder %s703_s29, 4   ;;  %s799_s20 = smov %s610_s21 }
 0x1a1   : > { %s800_s21 = smov %s614_s22  ;;  %s801_s22 = smov %s720_s12 }
 0x1a2   : > { %s802_s23 = smov %s703_s29  ;;  %20 = sbr.rel (!%p18_p7) target bundleno = 7 (0x7), region = 84 }
 0x1a7   :  { %384 = vsyncpa [#allocation4], 1 }
 0x1a8   :  { %386 = vsyncpa [#allocation4 + $0x1], 1 }
 0x1a9   :  { %387 = vsyncpa [#allocation6], 1 }

</bundles_post_ra>
